<compile_context>
chip_gen: v7x
topology: tpu7x:2x2x1
jax: 0.10.0
libtpu: 0.0.40
codegen_flags: <defaults>
</compile_context>

<pallas_src>
import jax
import jax.numpy as jnp
from jax.experimental import pallas as pl
from jax.experimental.pallas import tpu as pltpu


def _shape_layer_kernel(params_ref, comp_ref, mean_ref, out_ref):
    # params_ref: (B, K)   -- VMEM-resident across the whole grid (constant map)
    # comp_ref:   (K, TN)  -- streamed tile of the eigen-components along N=P*D
    # mean_ref:   (1, TN)  -- streamed tile of the mean shape
    # out_ref:    (B, TN)  -- lane-dense output tile
    acc = jnp.dot(params_ref[...], comp_ref[...],
                  preferred_element_type=jnp.float32)
    # Mean add stays in f32 on the VPU (free slot in a mem-bound kernel), so
    # bf16 components do not degrade the mean/accumulation precision.
    out_ref[...] = (acc + mean_ref[...].astype(jnp.float32)).astype(out_ref.dtype)


def _round_up(x, m):
    return ((x + m - 1) // m) * m


def _vmem_capacity_bytes():
    """Per-TC VMEM capacity; conservative (v7x-sized) default if query fails."""
    try:
        return int(pltpu.get_tpu_info().vmem_capacity_bytes)
    except Exception:  # pragma: no cover - e.g. interpret mode / CPU tracing
        return 64 << 20


def _pick_tile_n(n, k, b, comp_item, mean_item, out_item, params_item,
                 budget_bytes, max_tile_n):
    """Largest TN (multiple of 128) whose double-buffered working set fits the
    VMEM budget. Big tiles keep the per-step DMA far above grid-step overhead."""
    cap = min(_round_up(n, 128), _round_up(max_tile_n, 128))

    def usage(t):
        # double-buffered streams (components, mean, out) + resident params
        return 2 * t * (k * comp_item + mean_item + b * out_item) + b * k * params_item

    tn = cap
    while tn > 128 and usage(tn) > budget_bytes:
        tn -= 128
    return max(tn, 128)


def shape_layer_forward(shape_params, mean, components, *,
                        min_pallas_bytes=1 << 20, max_tile_n=65536):
    """Pallas equivalent of _ShapeLayer.forward.

    Args:
      shape_params: (B, K, 1, 1)
      mean:         (1, P, D) (or (P, D))
      components:   (1, K, P, D)
    Returns:
      shapes:       (B, P, D)
    """
    B = shape_params.shape[0]
    K = components.shape[-3]
    P, D = components.shape[-2], components.shape[-1]
    N = P * D
    out_dtype = jnp.result_type(shape_params.dtype, mean.dtype, components.dtype)

    params2d = shape_params.reshape(B, K)   # free views, streamed as-is
    comp2d = components.reshape(K, N)
    mean2d = mean.reshape(1, N)

    comp_item = jnp.dtype(components.dtype).itemsize
    mean_item = jnp.dtype(mean.dtype).itemsize
    params_item = jnp.dtype(shape_params.dtype).itemsize
    out_item = jnp.dtype(out_dtype).itemsize

    # Tiny problems: pallas_call launch + grid-step overhead dominates; use the
    # fused XLA op with identical numerics (f32 accumulate + f32 mean add).
    problem_bytes = K * N * comp_item + N * mean_item + B * N * out_item
    if problem_bytes < min_pallas_bytes or N < 128:
        acc = jnp.dot(params2d, comp2d, preferred_element_type=jnp.float32)
        out2d = (acc + mean2d.astype(jnp.float32)).astype(out_dtype)
        return out2d.reshape(B, P, D)

    vmem_cap = _vmem_capacity_bytes()
    budget = vmem_cap // 2                       # tile-picking budget
    tn = _pick_tile_n(N, K, B, comp_item, mean_item, out_item, params_item,
                      budget, max_tile_n)
    grid = (pl.cdiv(N, tn),)                     # ragged last tile handled by Pallas

    usage = (2 * tn * (K * comp_item + mean_item + B * out_item)
             + B * K * params_item)
    vmem_limit = int(min(int(0.75 * vmem_cap), max(32 << 20, 2 * usage)))
    vmem_limit = max(vmem_limit, 2 * usage)      # never request less than we use

    cost = pl.CostEstimate(
        flops=2 * B * K * N,
        transcendentals=0,
        bytes_accessed=(K * N * comp_item + N * mean_item
                        + B * K * params_item + B * N * out_item),
    )

    out2d = pl.pallas_call(
        _shape_layer_kernel,
        out_shape=jax.ShapeDtypeStruct((B, N), out_dtype),
        grid=grid,
        in_specs=[
            # params stay VMEM-resident across the grid (constant index_map).
            pl.BlockSpec((B, K), lambda n: (0, 0)),
            # components streamed tile-by-tile along N (dominant HBM stream).
            pl.BlockSpec((K, tn), lambda n: (0, n)),
            # mean streamed alongside, added in-kernel (no wrapper concat).
            pl.BlockSpec((1, tn), lambda n: (0, n)),
        ],
        out_specs=pl.BlockSpec((B, tn), lambda n: (0, n)),
        compiler_params=pltpu.CompilerParams(
            dimension_semantics=("parallel",),   # shard N tiles across TCs
            vmem_limit_bytes=vmem_limit,
        ),
        cost_estimate=cost,
    )(params2d, comp2d, mean2d)

    # NOTE: if B grows to hundreds+, add an INNER grid axis over B (params tiled
    # (TB, K), components index_map depending only on n) so the (K, tn)
    # components tile is still fetched exactly once per N tile.
    return out2d.reshape(B, P, D)                # free view


if __name__ == "__main__":
    key = jax.random.PRNGKey(0)
    k1, k2, k3 = jax.random.split(key, 3)

    def reference(shape_params, mean, components):
        b = shape_params.shape[0]
        comps_e = jnp.broadcast_to(components, (b,) + components.shape[1:])
        weighted = comps_e * jnp.broadcast_to(shape_params, comps_e.shape)
        return mean + weighted.sum(axis=1)

    # --- Case 1: typical tiny ASM landmark shapes -> fused-XLA fallback path. ---
    B, K, P, D = 4, 8, 68, 2
    sp = jax.random.normal(k1, (B, K, 1, 1), dtype=jnp.float32)
    mu = jax.random.normal(k2, (1, P, D), dtype=jnp.float32)
    comps = jax.random.normal(k3, (1, K, P, D), dtype=jnp.float32)
    out = jax.block_until_ready(shape_layer_forward(sp, mu, comps))
    assert out.shape == (B, P, D)
    assert jnp.allclose(out, reference(sp, mu, comps), atol=1e-5, rtol=1e-5)

    # --- Case 2: exercise the Pallas kernel (multi-tile grid + ragged edge). ---
    B2, K2, P2, D2 = 4, 8, 1100, 2   # N = 2200: 4 full 512-lane tiles + ragged 152
    sp2 = jax.random.normal(k1, (B2, K2, 1, 1), dtype=jnp.float32)
    mu2 = jax.random.normal(k2, (1, P2, D2), dtype=jnp.float32)
    comps2 = jax.random.normal(k3, (1, K2, P2, D2), dtype=jnp.float32)
    out2 = shape_layer_forward(sp2, mu2, comps2,
                               min_pallas_bytes=0, max_tile_n=512)
    out2 = jax.block_until_ready(out2)
    assert out2.shape == (B2, P2, D2)
    assert jnp.allclose(out2, reference(sp2, mu2, comps2), atol=1e-5, rtol=1e-5)

    print("KERNEL_OK")
</pallas_src>

<mosaic_0001>
module attributes {stable_mosaic.version = 11 : i64} {
  func.func @_shape_layer_kernel(%arg0: i32, %arg1: memref<4x8xf32, #tpu.memory_space<vmem>>, %arg2: memref<8x512xf32, #tpu.memory_space<vmem>>, %arg3: memref<1x512xf32, #tpu.memory_space<vmem>>, %arg4: memref<4x512xf32, #tpu.memory_space<vmem>>) attributes {dimension_semantics = [#tpu.dimension_semantics<parallel>], iteration_bounds = array<i64: 5>, scalar_prefetch = 0 : i64, scratch_operands = 0 : i64, tpu.core_type = #tpu.core_type<tc>, window_params = [{pipeline_mode = #tpu.pipeline_mode<synchronous>, transform_indices = @transform_0, window_bounds = array<i64: 4, 8>}, {transform_indices = @transform_1, window_bounds = array<i64: 8, 512>}, {transform_indices = @transform_2, window_bounds = array<i64: 1, 512>}, {transform_indices = @transform_3, window_bounds = array<i64: 4, 512>}]} {
    %c0 = arith.constant 0 : index
    %c0_0 = arith.constant 0 : index
    %0 = vector.load %arg1[%c0, %c0_0] : memref<4x8xf32, #tpu.memory_space<vmem>>, vector<4x8xf32>
    %c0_1 = arith.constant 0 : index
    %c0_2 = arith.constant 0 : index
    %1 = vector.load %arg2[%c0_1, %c0_2] : memref<8x512xf32, #tpu.memory_space<vmem>>, vector<8x512xf32>
    %cst = arith.constant dense<0.000000e+00> : vector<4x512xf32>
    %2 = tpu.matmul %0, %1, %cst {dimension_numbers = #tpu.dot_dimension_numbers<[1], [0], [0], [1], [0, 0, 1, 1], [], []>} : vector<4x8xf32>, vector<8x512xf32>, vector<4x512xf32> -> vector<4x512xf32>
    %c0_3 = arith.constant 0 : index
    %c0_4 = arith.constant 0 : index
    %3 = vector.load %arg3[%c0_3, %c0_4] : memref<1x512xf32, #tpu.memory_space<vmem>>, vector<1x512xf32>
    %4 = vector.broadcast %3 : vector<1x512xf32> to vector<4x512xf32>
    %5 = arith.addf %2, %4 : vector<4x512xf32>
    %c0_5 = arith.constant 0 : index
    %c0_6 = arith.constant 0 : index
    %6 = vector.load %arg4[%c0_5, %c0_6] : memref<4x512xf32, #tpu.memory_space<vmem>>, vector<4x512xf32>
    tpu.vector_store %arg4[%c0_5, %c0_6], %5 {strides = array<i32>} : memref<4x512xf32, #tpu.memory_space<vmem>>, vector<4x512xf32>,
    return
  }
  func.func @transform_0(%arg0: i32) -> (i32, i32) {
    %c0_i32 = arith.constant 0 : i32
    %c0_i32_0 = arith.constant 0 : i32
    %c0_i32_1 = arith.constant 0 : i32
    return %c0_i32, %c0_i32_0 : i32, i32
  }
  func.func @transform_1(%arg0: i32) -> (i32, i32) {
    %c0_i32 = arith.constant 0 : i32
    %c0_i32_0 = arith.constant 0 : i32
    return %c0_i32, %arg0 : i32, i32
  }
  func.func @transform_2(%arg0: i32) -> (i32, i32) {
    %c0_i32 = arith.constant 0 : i32
    %c0_i32_0 = arith.constant 0 : i32
    return %c0_i32, %arg0 : i32, i32
  }
  func.func @transform_3(%arg0: i32) -> (i32, i32) {
    %c0_i32 = arith.constant 0 : i32
    %c0_i32_0 = arith.constant 0 : i32
    return %c0_i32, %arg0 : i32, i32
  }
}

</mosaic_0001>

<bundles_post_ra>
// kernel: tpu_custom_call.1
= control target key start
LH: loop header
LB: loop body
LE: loop exit
PB: predicated region body
PF: predicated region fallthrough
CT: control target
= control target key end

     0   :  { %8 = vsyncpa [#allocation3], 0  ;;  %s1074_s0 = inlined_call_operand.hbm [shape: f32[4,8], index: 0, kind: input, shape index: {}]   ;;  %s1075_s1 = inlined_call_operand.hbm [shape: f32[8,2200], index: 1, kind: input, shape index: {}]   ;;  %s1076_s2 = inlined_call_operand.hbm [shape: f32[1,2200], index: 2, kind: input, shape index: {}]   ;;  %s1077_s3 = inlined_call_operand.hbm [shape: f32[4,2200], index: 3, kind: output, shape index: {}]  }
   0x1   :  { %9 = vsyncpa [#allocation6], 0 }
   0x2   :  { %11 = vsyncpa [#allocation6 + $0x1], 0 }
   0x3   :  { %12 = vsyncpa [#allocation4], 0 }
   0x4   :  { %14 = vsyncpa [#allocation4 + $0x1], 0  ;;  %s835_s12 = smov 0   ;;  %s837_s13 = smov 0  }
   0x5   :  { %s839_s14 = smov 0   ;;  %s841_s15 = smov 0  }
   0x6 LB: > { %s856_s16 = sadd.s32 4294967295, %s808_s15   ;;  %s567_s17 = sadd.s32 4294967294, %s808_s15   ;;  %s808_s15 = sphi %s841_s15, %s1098_s15   ;;  %s804_s14 = sphi %s839_s14, %s1097_s14   ;;  %s800_s13 = sphi %s837_s13, %s1096_s13   ;;  %s796_s12 = sphi %s835_s12, %s1095_s12  }
   0x7   : > { %s860_s18 = sadd.s32 1, %s808_s15   ;;  %s48_s19 = sadd.s32 1, %s804_s14 }
   0x8   : > { %s45_s20 = ssub.s32 %s808_s15, %s860_s18  ;;  %p55_p0 = scmp.ne.s32.totalorder %s804_s14, %s800_s13 }
   0x9   : > { %p46_p1 = scmp.eq.s32.totalorder %s45_s20, 0  ;;  %p56_p2 = scmp.eq.s32.totalorder %s808_s15, 0 }
   0xa   : > { %p61_p3 = scmp.ne.s32.totalorder %s800_s13, %s796_s12  ;;  %p1078_p4 = scmp.eq.s32.totalorder %s856_s16, 0 }
   0xb   : > { %s872_s21 = scalar_select %p46_p1, %s804_s14, %s48_s19  }
   0xc   : > { %p874_p5 = por %p56_p2, %p55_p0  ;;  %p880_p6 = por %p1078_p4, %p61_p3 }
   0xd   : > { %p111_p7 = scmp.eq.s32.totalorder %s856_s16, 4  ;;  %p117_p8 = scmp.eq.s32.totalorder %s567_s17, 4 }
   0xe   : > { %s1081_s22 = scalar_select %p874_p5, 1, 0 }
   0xf   : > { %s1082_s23 = scalar_select %p880_p6, 1, 0 }
  0x10   : > { %p568_p9 = scmp.ge.s32.totalorder %s808_s15, 1  ;;  %p124_p10 = scmp.lt.s32.totalorder %s808_s15, 6 }
  0x11   : > { %p887_p11 = por %p111_p7, %p55_p0  ;;  %p891_p12 = por %p117_p8, %p61_p3 }
  0x12   : > { %p895_p13 = pnand %p568_p9, %p124_p10  ;;  %s810_s27 = smov [#allocation2]  }
  0x13   : > { %s1083_s24 = scalar_select %p887_p11, 1, 0 }
  0x14   : > { %s1084_s25 = scalar_select %p891_p12, 1, 0 }
  0x15   : > { %s1085_s26 = scalar_select %p895_p13, 1, 0 }
  0x16   : > { %p609_p1 = pneg %p895_p13  ;;  %s137_s28 = sshll.u32 %s810_s27, 4  ;;  %s138_s28 = int_to_ptr.vmem [resolvable:$true] %s137_s28 }
  0x17   : > { %s654_s5 = scalar_lea.hbm %s1074_s0, 64 }
  0x18   : > { %p903_p2 = pnand %p609_p1, %p1078_p4  ;;  %p655_p0 = scmp.ne.s32.totalorder %s1074_s0, %s654_s5 }
  0x19   : > { %p661_p9 = scmp.lt.u32.totalorder %s654_s5, %s1074_s0 }
  0x1a   : > { %p656_p3 = pneg %p903_p2 }
  0x1c   : > { %p657_p7 = pnand %p656_p3, %p655_p0 }
  0x1e   : > { %p658_p8 = pneg %p657_p7 }
  0x20   : > { %p663_p10 = pnand %p661_p9, %p658_p8 }
  0x22   : > { %666 = shalt.err (!%p663_p10)
}
  0x23   : > { %s667_s10 = scalar_lea.vmem %s138_s28, 64  ;;  %p675_p11 = scmp.lt.s32.totalorder %s138_s28, %s138_s28 }
  0x24   : > { %p668_p1 = scmp.ne.s32.totalorder %s138_s28, %s667_s10  ;;  %p676_p6 = scmp.lt.s32.totalorder %s667_s10, %s667_s10 }
  0x26   : > { %p670_p4 = pnand %p668_p1, %p656_p3  ;;  %p677_p13 = por %p676_p6, %p675_p11 }
  0x28   : > { %p671_p12 = pneg %p670_p4 }
  0x2a   : > { %p678_p5 = pnand %p677_p13, %p671_p12 }
  0x2c   : > { %681 = shalt.err (!%p678_p5)
}
  0x2d   : > { %612 = dma.hbm_to_vmem [thread:$0]  (!%p903_p2), %s1074_s0, 64, %s138_s28, [#allocation3]  }
  0x2e   : > { %p570_p0 = scmp.ge.s32.totalorder %s808_s15, 5 }
  0x2f   : > { %p1087_p7 = scmp.ne.s32.totalorder (!%p570_p0), %s1081_s22, 0 }
  0x30   : > { %144 = sbr.rel (%p570_p0) target bundleno = 125 (0x7d), region = 20 }
  0x37   : > { %147 = sbr.rel (!%p1087_p7) target bundleno = 89 (0x59), region = 24  ;;  %s148_s19 = sand.u32 (%p1087_p7), 1, %s808_s15  }
  0x38   : > { %s150_s20 = sand.u32 (%p1087_p7), 1, %s804_s14   ;;  %s572_s30 = sshll.u32 (%p1087_p7), %s808_s15, 2 }
  0x39   : > { %s571_s27 = sshll.u32 (%p1087_p7), %s150_s20, 5  ;;  %s154_s4 = ssub.s32 (%p1087_p7), 18, %s572_s30 }
  0x3a   : > { %p155_p4 = scmp.lt.s32.totalorder (%p1087_p7), %s154_s4, 4  ;;  %s932_s5 = scalar_lea.sflag (%p1087_p7), [#allocation6], %s148_s19 }
  0x3b   : > { %s152_s6 = scalar_lea.vmem (%p1087_p7), [#allocation5], %s571_s27 }
  0x3e   : > { %s1100_s4 = smov (!%p155_p4, %s154_s4), 4 }
  0x3f   : > { %s929_s29 = sshll.u32 %s1100_s4, 7 }
  0x40   : > { %s159_s28 = ssub.s32 512, %s929_s29 }
  0x41   : > { %160 = vsyncadd %s932_s5, %s159_s28  ;;  %p574_p5 = scmp.ne.s32.totalorder %s929_s29, 0  ;;  %s599_s7 = sshll.u32 %s808_s15, 9 }
  0x42   : > { %s940_s10 = scalar_lea.hbm %s1075_s1, %s599_s7  ;;  %s166_s11 = sshll.u32 %s152_s6, 4  ;;  %s167_s11 = int_to_ptr.vmem [resolvable:$true] %s166_s11 }
  0x43   : > { %s682_s17 = scalar_lea.hbm %s940_s10, %s929_s29  ;;  %s686_s27 = scalar_lea.hbm %s1075_s1, 2304 }
  0x44   : > { %p683_p6 = scmp.ne.s32.totalorder %s940_s10, %s682_s17  ;;  %p687_p13 = scmp.lt.u32.totalorder %s940_s10, %s1075_s1 }
  0x45   : > { %p688_p2 = scmp.lt.u32.totalorder %s686_s27, %s682_s17  ;;  %p690_p8 = scmp.lt.u32.totalorder %s682_s17, %s940_s10 }
  0x46   : > { %p684_p11 = pnand %p683_p6, %p574_p5 }
  0x47   : > { %p689_p3 = por %p688_p2, %p687_p13 }
  0x48   : > { %p685_p12 = pneg %p684_p11 }
  0x49   : > { %p691_p9 = por %p690_p8, %p689_p3 }
  0x4b   : > { %p692_p10 = pnand %p691_p9, %p685_p12 }
  0x4d   : > { %695 = shalt.err (!%p692_p10)
}
  0x4e   : > { %s696_s28 = scalar_lea.vmem %s167_s11, %s929_s29  ;;  %s811_s6 = smov [#allocation5]  }
  0x4f   : > { %p697_p1 = scmp.ne.s32.totalorder %s167_s11, %s696_s28  ;;  %s700_s7 = sshll.u32 %s811_s6, 4  ;;  %s701_s7 = int_to_ptr.vmem [resolvable:$false] %s700_s7 }
  0x50   : > { %s702_s8 = scalar_lea.vmem %s701_s7, 1024  ;;  %p703_p4 = scmp.lt.s32.totalorder %s167_s11, %s701_s7 }
  0x51   : > { %p698_p0 = pnand %p697_p1, %p574_p5  ;;  %p704_p6 = scmp.lt.s32.totalorder %s702_s8, %s696_s28 }
  0x53   : > { %p699_p7 = pneg %p698_p0  ;;  %p705_p11 = por %p704_p6, %p703_p4 }
  0x55   : > { %p706_p2 = pnand %p705_p11, %p699_p7 }
  0x57   : > { %709 = shalt.err (!%p706_p2)
}
  0x58   : > { %169 = dma.hbm_to_vmem [thread:$0]  (%p574_p5), %s940_s10, %s929_s29, %s167_s11, %s932_s5  }
  0x59 PF: > { %p1088_p12 = scmp.ne.s32.totalorder %s1081_s22, 0 }
  0x5a   : > { %s173_s9 = sand.u32 (%p1088_p12), 1, %s808_s15   ;;  %s175_s17 = sand.u32 (%p1088_p12), 1, %s804_s14  }
  0x5b   : > { %172 = sbr.rel (!%p1088_p12) target bundleno = 125 (0x7d), region = 28  ;;  %s578_s19 = sshll.u32 (%p1088_p12), %s175_s17, 2 }
  0x5c   : > { %s579_s20 = sshll.u32 (%p1088_p12), %s808_s15, 2  ;;  %s971_s28 = scalar_lea.sflag (%p1088_p12), [#allocation6], %s173_s9 }
  0x5d   : > { %s179_s27 = ssub.s32 (%p1088_p12), 18, %s579_s20  ;;  %s177_s29 = scalar_lea.vmem (%p1088_p12), [#allocation7], %s578_s19 }
  0x5e   : > { %p180_p13 = scmp.lt.s32.totalorder (%p1088_p12), %s179_s27, 4 }
  0x62   : > { %s1102_s27 = smov (!%p180_p13, %s179_s27), 4 }
  0x63   : > { %s968_s30 = sshll.u32 %s1102_s27, 4 }
  0x64   : > { %s184_s4 = ssub.s32 64, %s968_s30 }
  0x65   : > { %185 = vsyncadd %s971_s28, %s184_s4  ;;  %p581_p5 = scmp.ne.s32.totalorder %s968_s30, 0  ;;  %s600_s22 = sshll.u32 %s808_s15, 6 }
  0x66   : > { %s979_s11 = scalar_lea.hbm %s1076_s2, %s600_s22  ;;  %s190_s6 = sshll.u32 %s177_s29, 4  ;;  %s191_s6 = int_to_ptr.vmem [resolvable:$true] %s190_s6 }
  0x67   : > { %s710_s7 = scalar_lea.hbm %s979_s11, %s968_s30  ;;  %s714_s17 = scalar_lea.hbm %s1076_s2, 288 }
  0x68   : > { %p711_p3 = scmp.ne.s32.totalorder %s979_s11, %s710_s7  ;;  %p715_p10 = scmp.lt.u32.totalorder %s979_s11, %s1076_s2 }
  0x69   : > { %p716_p1 = scmp.lt.u32.totalorder %s714_s17, %s710_s7  ;;  %p718_p7 = scmp.lt.u32.totalorder %s710_s7, %s979_s11 }
  0x6a   : > { %p712_p8 = pnand %p711_p3, %p581_p5 }
  0x6b   : > { %p717_p0 = por %p716_p1, %p715_p10 }
  0x6c   : > { %p713_p9 = pneg %p712_p8 }
  0x6d   : > { %p719_p4 = por %p718_p7, %p717_p0 }
  0x6f   : > { %p720_p6 = pnand %p719_p4, %p713_p9 }
  0x71   : > { %723 = shalt.err (!%p720_p6)
}
  0x72   : > { %s724_s27 = scalar_lea.vmem %s191_s6, %s968_s30  ;;  %s812_s4 = smov [#allocation7]  }
  0x73   : > { %p725_p11 = scmp.ne.s32.totalorder %s191_s6, %s724_s27  ;;  %s728_s29 = sshll.u32 %s812_s4, 4  ;;  %s729_s29 = int_to_ptr.vmem [resolvable:$false] %s728_s29 }
  0x74   : > { %s730_s22 = scalar_lea.vmem %s729_s29, 128  ;;  %p731_p13 = scmp.lt.s32.totalorder %s191_s6, %s729_s29 }
  0x75   : > { %p726_p2 = pnand %p725_p11, %p581_p5  ;;  %p732_p3 = scmp.lt.s32.totalorder %s730_s22, %s724_s27 }
  0x77   : > { %p727_p12 = pneg %p726_p2  ;;  %p733_p8 = por %p732_p3, %p731_p13 }
  0x79   : > { %p734_p1 = pnand %p733_p8, %p727_p12 }
  0x7b   : > { %737 = shalt.err (!%p734_p1)
}
  0x7c   : > { %193 = dma.hbm_to_vmem [thread:$0]  (%p581_p5), %s979_s11, %s968_s30, %s191_s6, %s971_s28  }
  0x7d PF: > { %p1089_p9 = scmp.ne.s32.totalorder %s1085_s26, 0 }
  0x7e   : > { %p1090_p10 = scmp.eq.s32.totalorder (!%p1089_p9), %s856_s16, 0 }
  0x7f   : > { %199 = sbr.rel (%p1089_p9) target bundleno = 389 (0x185), region = 32 }
  0x86   : > { %783 = dma.done.wait (%p1090_p10), [#allocation3], 64   ;;  %p1091_p0 = pmov %p1090_p10 }
  0x87   : > { %s205_s5 = sand.u32 1, %s856_s16   ;;  %s1010_s10 = sand.u32 1, %s800_s13  }
  0x88   : > { %785 = vsyncadd (%p1091_p0), [#allocation3], 4294967232  ;;  %s585_s7 = sshll.u32 %s1010_s10, 5  ;;  %s206_s30 = scalar_lea.sflag [#allocation6], %s205_s5 }
  0x89   : > { %s209_s28 = scalar_lea.vmem [#allocation5], %s585_s7  ;;  %p1092_p5 = scmp.ne.s32.totalorder %s1082_s23, 0 }
  0x8b   : > { %787 = dma.done.wait (%p1092_p5), %s206_s30, 576  }
  0x8c   : > { %789 = vsyncadd (%p1092_p5), %s206_s30, 4294966720  ;;  %v813_v0 = vmov 0.0   ;;  %v263_v1 = vld [vmem:[%s209_s28 + $0x8] sm:$0xff]  ;;  %v265_v2 = vld [vmem:[%s209_s28 + $0x18] sm:$0xff]  ;;  %vm288_vm0 = vcmask 64512   ;;  %v268_v6 = vlaneseq  ;;  %s586_s23 = sshll.u32 %s1010_s10, 2 }
  0x8d   : > { %356 = vmatprep.mubr.f32.mxu0 %v813_v0  ;;  %427 = vmatprep.mubr.f32.mxu1 %v813_v0  ;;  %v262_v3 = vld [vmem:[%s209_s28] sm:$0xff]  ;;  %v264_v4 = vld [vmem:[%s209_s28 + $0x10] sm:$0xff]  ;;  %v261_v5 = vld [vmem:[#allocation2] sm:$0xf]  ;;  %s218_s26 = scalar_lea.vmem [#allocation7], %s586_s23  ;;  %s587_s11 = sshll.u32 %s1010_s10, 4 }
  0x8e   : > { %292 = vmatprep.subr.mxu0 %v263_v1  ;;  %363 = vmatprep.subr.mxu1 %v265_v2  ;;  %v269_v7 = vshrl.u32 %v268_v6, 7  ;;  %v266_v10 = vld [vmem:[%s218_s26] sm:$0xf]  ;;  %s245_s6 = scalar_lea.vmem [#allocation8], %s587_s11  ;;  %s445_s8 = scalar_lea.sflag [#allocation4], %s1010_s10 }
  0x8f   : > { %293 = vmatpush1.msra.mxu0 %v262_v3  ;;  %364 = vmatpush1.msra.mxu1 %v264_v4  ;;  %p1093_p7 = scmp.ne.s32.totalorder %s1083_s24, 0 }
  0x90   : > { %588 = vmatmul.mubr.msk.f32.vlgmr.msra.gmra.mrb[0].mxu0 %vm288_vm0, %v261_v5  ;;  %589 = vmatmul.mubr.msk.f32.vlgmr.msra.gmra.mrb[0].mxu1 %vm288_vm0, %v261_v5  ;;  %v270_v8 = vsub.s32 0, %v269_v7  ;;  %v278_v9 = vsub.s32 2, %v269_v7  ;;  %v274_v11 = vsub.s32 1, %v269_v7  ;;  %v282_v12 = vsub.s32 3, %v269_v7  ;;  %s591_s9 = sshll.u32 (%p1093_p7), %s856_s16, 2 }
  0x91   : > { %s453_s17 = ssub.s32 (%p1093_p7), 18, %s591_s9 }
  0x92   : > { %v271_v13 = vrot.slane %v266_v10, %v270_v8  ;;  %v279_v14 = vrot.slane %v266_v10, %v278_v9  ;;  %v275_v15 = vrot.slane %v266_v10, %v274_v11  ;;  %v283_v16 = vrot.slane %v266_v10, %v282_v12  ;;  %p454_p4 = scmp.lt.s32.totalorder (%p1093_p7), %s453_s17, 4 }
 0x163   : > { %v358_v17 = vpop.f32.mrb[0].mxu0  ;;  %v429_v18 = vpop.f32.mrb[0].mxu1  ;;  %451 = sbr.rel (!%p1093_p7) target bundleno = 389 (0x185), region = 48 }
 0x164   : > { %v359_v19 = vadd.f32 %v358_v17, %v271_v13  ;;  %v430_v20 = vadd.f32 %v429_v18, %v279_v14  ;;  %v360_v21 = vpop.f32.mrb[1].mxu0  ;;  %v431_v22 = vpop.f32.mrb[1].mxu1 }
 0x165   : > { %v361_v23 = vadd.f32 %v360_v21, %v275_v15  ;;  %v432_v24 = vadd.f32 %v431_v22, %v283_v16 }
 0x167   : > { %v438_v25 = vcombine.low %v359_v19, %v361_v23  ;;  %v439_v26 = vcombine.low %v430_v20, %v432_v24 }
 0x169   : > { %442 = vst [vmem:[%s245_s6] sm:$0xff] %v438_v25  ;;  %443 = vst [vmem:[%s245_s6 + $0x8] sm:$0xff] %v439_v26 }
 0x16a   : > { %s1104_s17 = smov (!%p454_p4, %s453_s17), 4 }
 0x16b   : > { %s1023_s19 = sshll.u32 %s1104_s17, 6 }
 0x16c   : > { %s458_s20 = ssub.s32 256, %s1023_s19 }
 0x16d   : > { %459 = vsyncadd %s445_s8, %s458_s20  ;;  %p593_p6 = scmp.ne.s32.totalorder %s1023_s19, 0  ;;  %s601_s27 = sshll.u32 %s856_s16, 8 }
 0x16e   : > { %s1033_s29 = scalar_lea.hbm %s1077_s3, %s601_s27  ;;  %s465_s22 = sshll.u32 %s245_s6, 4  ;;  %s466_s22 = int_to_ptr.vmem [resolvable:$true] %s465_s22 }
 0x16f   : > { %s738_s5 = scalar_lea.vmem %s466_s22, %s1023_s19  ;;  %s814_s7 = smov [#allocation8]  }
 0x170   : > { %p739_p11 = scmp.ne.s32.totalorder %s466_s22, %s738_s5  ;;  %s742_s30 = sshll.u32 %s814_s7, 4  ;;  %s743_s30 = int_to_ptr.vmem [resolvable:$false] %s742_s30 }
 0x171   : > { %s744_s28 = scalar_lea.vmem %s743_s30, 512  ;;  %p745_p13 = scmp.lt.s32.totalorder %s466_s22, %s743_s30 }
 0x172   : > { %p740_p2 = pnand %p739_p11, %p593_p6  ;;  %p746_p3 = scmp.lt.s32.totalorder %s744_s28, %s738_s5 }
 0x174   : > { %p741_p12 = pneg %p740_p2  ;;  %p747_p8 = por %p746_p3, %p745_p13 }
 0x176   : > { %p748_p1 = pnand %p747_p8, %p741_p12 }
 0x178   : > { %751 = shalt.err (!%p748_p1)
}
 0x179   : > { %s752_s16 = scalar_lea.hbm %s1033_s29, %s1023_s19  ;;  %s756_s11 = scalar_lea.hbm %s1077_s3, 1152 }
 0x17a   : > { %p753_p9 = scmp.ne.s32.totalorder %s1033_s29, %s752_s16  ;;  %p757_p5 = scmp.lt.u32.totalorder %s1033_s29, %s1077_s3 }
 0x17b   : > { %p758_p7 = scmp.lt.u32.totalorder %s756_s11, %s752_s16  ;;  %p760_p11 = scmp.lt.u32.totalorder %s752_s16, %s1033_s29 }
 0x17c   : > { %p754_p10 = pnand %p753_p9, %p593_p6 }
 0x17d   : > { %p759_p4 = por %p758_p7, %p757_p5 }
 0x17e   : > { %p755_p0 = pneg %p754_p10 }
 0x17f   : > { %p761_p2 = por %p760_p11, %p759_p4 }
 0x181   : > { %p762_p12 = pnand %p761_p2, %p755_p0 }
 0x183   : > { %765 = shalt.err (!%p762_p12)
}
 0x184   : > { %468 = dma.vmem_to_hbm [thread:$0]  (%p593_p6), %s466_s22, %s1023_s19, %s1033_s29, %s445_s8  }
 0x185 PF: > { %p619_p13 = scmp.ge.s32.totalorder %s808_s15, 2  ;;  %s477_s17 = sand.u32 1, %s796_s12  }
 0x186   : > { %p1094_p3 = scmp.ne.s32.totalorder %s1084_s25, 0  ;;  %s478_s20 = scalar_lea.sflag [#allocation4], %s477_s17 }
 0x188   : > { %p614_p8 = pnand %p619_p13, %p1094_p3 }
 0x18a   : > { %791 = dma.done.wait (!%p614_p8), %s478_s20, 256  }
 0x18b   : > { %793 = vsyncadd (!%p614_p8), %s478_s20, 4294967040  ;;  %p17_p1 = scmp.ge.s32.totalorder %s860_s18, 7   ;;  %s1095_s12 = smov %s800_s13 }
 0x18c   : > { %s1096_s13 = smov %s804_s14  ;;  %s1097_s14 = smov %s872_s21 }
 0x18d   : > { %s1098_s15 = smov %s860_s18  ;;  %19 = sbr.rel (!%p17_p1) target bundleno = 6 (0x6), region = 93 }
 0x194   :  { %483 = vsyncpa [#allocation3], 1 }
 0x195   :  { %485 = vsyncpa [#allocation3 + $0x1], 1 }
 0x196   :  { %486 = vsyncpa [#allocation6], 1 }
 0x197   :  { %488 = vsyncpa [#allocation6 + $0x1], 1 }
 0x198   :  { %489 = vsyncpa [#allocation4], 1 }
 0x199   :  { %491 = vsyncpa [#allocation4 + $0x1], 1 }

</bundles_post_ra>
